<compile_context>
chip_gen: v7x
topology: tpu7x:2x2x1
jax: 0.10.0
libtpu: 0.0.40
codegen_flags: <defaults>
</compile_context>

<pallas_src>
import functools

import jax
import jax.numpy as jnp
import numpy as np
from jax import lax
from jax.experimental import pallas as pl
from jax.experimental.pallas import tpu as pltpu

EPS = 1e-5          # InstanceNorm2d default eps
NEG_SLOPE = 0.2     # LeakyReLU(0.2)


# --------------------------------------------------------------------------- #
# Kernels
# --------------------------------------------------------------------------- #
def embed_kernel(t_ref, we_ref, be_ref, e_ref):
    """Whole-batch embed MLP: ReLU(t @ We + be).  t:(N,Dt) We:(Dt,Cout) be:(1,Cout)."""
    e = jnp.dot(t_ref[...], we_ref[...], preferred_element_type=jnp.float32)
    e_ref[...] = jnp.maximum(e + be_ref[...], 0.0).astype(e_ref.dtype)


def conv_in_lrelu_kernel(x_ref, b_ref, gamma_ref, beta_ref, p_ref, e_ref, o_ref,
                         *, kh_taps, pad_h):
    """One batch sample per grid step.  Everything is lane-packed (w, c) -> lanes.

    x_ref:     (1, H, W*Cin)        sample, channels folded into lanes
    b_ref:     (KH, W*Cin, W*Cout)  block-Toeplitz conv weights (kw taps + W-pad folded in)
    gamma_ref: (1, W*Cout)          IN scale, pre-tiled to the interleaved lane layout
    beta_ref:  (1, W*Cout)          IN shift, pre-tiled
    p_ref:     (W*Cout, W*Cout)     per-channel averaging operator (/ (H*W)) in lane layout
    e_ref:     (1, W*Cout)          ReLU(Linear(t)) for this sample, pre-tiled
    o_ref:     (1, H, W*Cout)       output slab (lane-dense store)
    """
    x = x_ref[0]                                       # (H, W*Cin)  f32
    H, WCin = x.shape
    WCout = o_ref.shape[2]

    # --- conv: KH block-Toeplitz matmuls; H zero-padding = shifted rows ---------------
    acc = jnp.zeros((H, WCout), jnp.float32)
    for kh in range(kh_taps):
        off = kh - pad_h                               # output row h reads input row h+off
        if off == 0:
            xs = x
        elif off > 0:
            zrows = jnp.zeros((off, WCin), jnp.float32)
            xs = jnp.concatenate([x[off:, :], zrows], axis=0)
        else:
            zrows = jnp.zeros((-off, WCin), jnp.float32)
            xs = jnp.concatenate([zrows, x[:off, :]], axis=0)
        acc = acc + jnp.dot(xs, b_ref[kh], preferred_element_type=jnp.float32)

    # --- InstanceNorm2d: one-pass sum / sum-of-squares, channel reduce via one matmul --
    s1 = jnp.sum(acc, axis=0, keepdims=True)           # (1, W*Cout)   sum over H (sublane)
    s2 = jnp.sum(acc * acc, axis=0, keepdims=True)     # (1, W*Cout)
    stats = jnp.concatenate([s1, s2], axis=0)          # (2, W*Cout)
    red = jnp.dot(stats, p_ref[...],                   # reduce over w per channel,
                  preferred_element_type=jnp.float32)  # broadcast back, divide by H*W
    mean = red[0:1, :]                                 # (1, W*Cout) per-channel E[x]
    var = red[1:2, :] - mean * mean                    # biased variance (PyTorch IN)
    inv = lax.rsqrt(var + EPS)

    y = (acc - mean) * (inv * gamma_ref[...]) + beta_ref[...]

    # --- LeakyReLU(0.2) + broadcast embed add ------------------------------------------
    y = jnp.where(y > 0, y, NEG_SLOPE * y)
    o_ref[0] = (y + e_ref[...]).astype(o_ref.dtype)


# --------------------------------------------------------------------------- #
# Wrapper
# --------------------------------------------------------------------------- #
def _build_toeplitz_weights(w_oihw, W, padding):
    """Fold (kw, Cin->Cout) taps and the W zero-padding into KH (W*Cin, W*Cout) matrices."""
    Cout, Cin, KH, KW = w_oihw.shape
    wt = jnp.transpose(w_oihw, (2, 3, 1, 0)).astype(jnp.float32)  # (KH, KW, Cin, Cout)
    mats = []
    for kh in range(KH):
        Bk = jnp.zeros((W * Cin, W * Cout), jnp.float32)
        for kw in range(KW):
            off = kw - padding                       # input col = output col + off
            w_lo, w_hi = max(0, -off), min(W, W - off)
            if w_lo >= w_hi:
                continue
            nw = w_hi - w_lo
            blk = jnp.kron(jnp.eye(nw, dtype=jnp.float32), wt[kh, kw])  # (nw*Cin, nw*Cout)
            Bk = Bk.at[(w_lo + off) * Cin:(w_hi + off) * Cin,
                       w_lo * Cout:w_hi * Cout].add(blk)
        mats.append(Bk)
    return jnp.stack(mats, axis=0)                   # (KH, W*Cin, W*Cout)


def conv_instance_norm_relu(x_nchw, t, w_oihw, gamma, beta, we, be, *, padding=1):
    """NCHW in/out (PyTorch convention); lane-dense (N, H, W*C) slabs inside the kernel."""
    N, Cin, H, W = x_nchw.shape
    Cout, Cin2, KH, KW = w_oihw.shape
    assert Cin2 == Cin
    assert KH - 1 == 2 * padding and KW - 1 == 2 * padding, "same-size conv (stride 1) only"
    Dt = t.shape[1]
    WCin, WCout = W * Cin, W * Cout

    # lane-dense repack: NCHW -> NHWC -> (N, H, W*Cin)   (layout plumbing, free)
    x_rows = jnp.transpose(x_nchw, (0, 2, 3, 1)).reshape(N, H, WCin)

    # conv weights with kw taps + W padding folded in (no jnp.pad anywhere)
    b_rows = _build_toeplitz_weights(w_oihw, W, padding)            # (KH, W*Cin, W*Cout)

    # per-channel averaging operator in the interleaved lane layout
    p_mat = jnp.kron(jnp.ones((W, W), jnp.float32),
                     jnp.eye(Cout, dtype=jnp.float32)) / float(H * W)  # (W*Cout, W*Cout)

    gamma_l = jnp.tile(gamma.astype(jnp.float32).reshape(1, Cout), (1, W))   # (1, W*Cout)
    beta_l = jnp.tile(beta.astype(jnp.float32).reshape(1, Cout), (1, W))

    # embed MLP once for the whole batch (off the per-sample MXU path)
    e = pl.pallas_call(
        embed_kernel,
        out_shape=jax.ShapeDtypeStruct((N, Cout), jnp.float32),
    )(t.astype(jnp.float32), we.astype(jnp.float32),
      be.astype(jnp.float32).reshape(1, Cout))
    e_l = jnp.tile(e, (1, W))                                        # (N, W*Cout)

    kernel = functools.partial(conv_in_lrelu_kernel, kh_taps=KH, pad_h=padding)

    # explicit VMEM budget (in/out blocks are double-buffered) with generous headroom
    itemsize = 4
    blk_in = H * WCin * itemsize
    blk_out = H * WCout * itemsize
    weights = (KH * WCin * WCout + WCout * WCout + 4 * WCout) * itemsize
    budget = 2 * (blk_in + blk_out + weights)
    vmem_limit = int(min(max(4 * budget, 8 * 1024 * 1024), 48 * 1024 * 1024))

    out_rows = pl.pallas_call(
        kernel,
        out_shape=jax.ShapeDtypeStruct((N, H, WCout), x_nchw.dtype),
        grid_spec=pltpu.PrefetchScalarGridSpec(
            num_scalar_prefetch=0,
            grid=(N,),
            in_specs=[
                pl.BlockSpec((1, H, WCin), lambda n: (n, 0, 0)),
                pl.BlockSpec((KH, WCin, WCout), lambda n: (0, 0, 0)),
                pl.BlockSpec((1, WCout), lambda n: (0, 0)),
                pl.BlockSpec((1, WCout), lambda n: (0, 0)),
                pl.BlockSpec((WCout, WCout), lambda n: (0, 0)),
                pl.BlockSpec((1, WCout), lambda n: (n, 0)),
            ],
            out_specs=pl.BlockSpec((1, H, WCout), lambda n: (n, 0, 0)),
        ),
        compiler_params=pltpu.CompilerParams(
            dimension_semantics=("parallel",),
            vmem_limit_bytes=vmem_limit,
        ),
    )(x_rows, b_rows, gamma_l, beta_l, p_mat, e_l)

    # un-pack: (N, H, W*Cout) -> (N, H, W, Cout) -> NCHW
    return jnp.transpose(out_rows.reshape(N, H, W, Cout), (0, 3, 1, 2))


# --------------------------------------------------------------------------- #
# Pure-JAX reference (same semantics as the PyTorch module)
# --------------------------------------------------------------------------- #
def reference(x_nchw, t, w_oihw, gamma, beta, we, be, *, padding=1):
    conv = lax.conv_general_dilated(
        x_nchw, w_oihw, window_strides=(1, 1),
        padding=[(padding, padding), (padding, padding)],
        dimension_numbers=("NCHW", "OIHW", "NCHW"))
    mean = conv.mean(axis=(2, 3), keepdims=True)
    var = ((conv - mean) ** 2).mean(axis=(2, 3), keepdims=True)
    y = (conv - mean) / jnp.sqrt(var + EPS)
    y = y * gamma.reshape(1, -1, 1, 1) + beta.reshape(1, -1, 1, 1)
    y = jnp.where(y > 0, y, NEG_SLOPE * y)
    e = jnp.maximum(t @ we + be, 0.0)
    return y + e[:, :, None, None]


if __name__ == "__main__":
    # Small deterministic example: filters=8, kernel_size=3, padding=1.
    N, Cin, H, W = 2, 4, 16, 16
    Cout, KH, KW = 8, 3, 3
    Dt = 8

    key = jax.random.PRNGKey(0)
    kx, kt, kwght, kwe, kbe = jax.random.split(key, 5)

    x = jax.random.normal(kx, (N, Cin, H, W), jnp.float32)
    t = jax.random.normal(kt, (N, Dt), jnp.float32)

    # Conv2d(filters, bias=False) weight (OIHW), deterministic init
    w_oihw = jax.random.normal(kwght, (Cout, Cin, KH, KW), jnp.float32) * 0.1
    # InstanceNorm2d(affine=True) default init
    gamma = jnp.ones((Cout,), jnp.float32)
    beta = jnp.zeros((Cout,), jnp.float32)
    # LazyLinear(filters) weight stored as (Dt, Cout) for the kernel
    we = jax.random.normal(kwe, (Dt, Cout), jnp.float32) * 0.1
    be = jax.random.normal(kbe, (Cout,), jnp.float32) * 0.1

    out = conv_instance_norm_relu(x, t, w_oihw, gamma, beta, we, be, padding=1)
    out = jax.block_until_ready(out)

    ref = reference(x, t, w_oihw, gamma, beta, we, be, padding=1)
    np.testing.assert_allclose(np.asarray(out), np.asarray(ref), rtol=2e-4, atol=2e-4)

    print("KERNEL_OK")
</pallas_src>

<mosaic_0001>
module attributes {stable_mosaic.version = 11 : i64} {
  func.func @embed_kernel(%arg0: memref<2x8xf32, #tpu.memory_space<vmem>>, %arg1: memref<8x8xf32, #tpu.memory_space<vmem>>, %arg2: memref<1x8xf32, #tpu.memory_space<vmem>>, %arg3: memref<2x8xf32, #tpu.memory_space<vmem>>) attributes {dimension_semantics = [], scalar_prefetch = 0 : i64, scratch_operands = 0 : i64, tpu.core_type = #tpu.core_type<tc>} {
    %c0 = arith.constant 0 : index
    %c0_0 = arith.constant 0 : index
    %0 = vector.load %arg0[%c0, %c0_0] : memref<2x8xf32, #tpu.memory_space<vmem>>, vector<2x8xf32>
    %c0_1 = arith.constant 0 : index
    %c0_2 = arith.constant 0 : index
    %1 = vector.load %arg1[%c0_1, %c0_2] : memref<8x8xf32, #tpu.memory_space<vmem>>, vector<8x8xf32>
    %cst = arith.constant dense<0.000000e+00> : vector<2x8xf32>
    %2 = tpu.matmul %0, %1, %cst {dimension_numbers = #tpu.dot_dimension_numbers<[1], [0], [0], [1], [0, 0, 1, 1], [], []>} : vector<2x8xf32>, vector<8x8xf32>, vector<2x8xf32> -> vector<2x8xf32>
    %c0_3 = arith.constant 0 : index
    %c0_4 = arith.constant 0 : index
    %3 = vector.load %arg2[%c0_3, %c0_4] : memref<1x8xf32, #tpu.memory_space<vmem>>, vector<1x8xf32>
    %4 = vector.broadcast %3 : vector<1x8xf32> to vector<2x8xf32>
    %5 = arith.addf %2, %4 : vector<2x8xf32>
    %cst_5 = arith.constant 0.000000e+00 : f32
    %6 = vector.broadcast %cst_5 : f32 to vector<2x8xf32>
    %7 = arith.maximumf %5, %6 : vector<2x8xf32>
    %c0_6 = arith.constant 0 : index
    %c0_7 = arith.constant 0 : index
    %8 = vector.load %arg3[%c0_6, %c0_7] : memref<2x8xf32, #tpu.memory_space<vmem>>, vector<2x8xf32>
    tpu.vector_store %arg3[%c0_6, %c0_7], %7 {strides = array<i32>} : memref<2x8xf32, #tpu.memory_space<vmem>>, vector<2x8xf32>,
    return
  }
}

</mosaic_0001>

<bundles_post_ra>
// kernel: tpu_custom_call.1
= control target key start
LH: loop header
LB: loop body
LE: loop exit
PB: predicated region body
PF: predicated region fallthrough
CT: control target
= control target key end

     0   :  { %8 = vsyncpa [#allocation3], 0  ;;  %s291_s0 = inlined_call_operand.hbm [shape: f32[2,8], index: 0, kind: input, shape index: {}]   ;;  %s292_s1 = inlined_call_operand.hbm [shape: f32[8,8], index: 1, kind: input, shape index: {}]   ;;  %s293_s2 = inlined_call_operand.vmem [shape: f32[1,8], index: 2, kind: input, shape index: {}]   ;;  %s294_s3 = inlined_call_operand.hbm [shape: f32[2,8], index: 3, kind: output, shape index: {}]  }
   0x1   :  { %9 = vsyncpa [#allocation6], 0 }
   0x2   :  { %10 = vsyncpa [#allocation4], 0  ;;  %s227_s12 = smov [#allocation2]   ;;  %s228_s14 = smov [#allocation5]  }
   0x3   :  { %s17_s13 = sshll.u32 %s227_s12, 4  ;;  %s27_s15 = sshll.u32 %s228_s14, 4  ;;  %s18_s13 = int_to_ptr.vmem [resolvable:$true] %s17_s13  ;;  %s28_s15 = int_to_ptr.vmem [resolvable:$true] %s27_s15 }
   0x4   :  { %s155_s18 = scalar_lea.hbm %s291_s0, 32 }
   0x5   :  { %p156_p0 = scmp.ne.s32.totalorder %s291_s0, %s155_s18  ;;  %p159_p1 = scmp.lt.u32.totalorder %s155_s18, %s291_s0 }
   0x7   :  { %p161_p2 = pnand %p159_p1, %p156_p0 }
   0x9   :  { %164 = shalt.err (!%p161_p2)
}
   0xa   :  { %s165_s23 = scalar_lea.vmem %s18_s13, 32  ;;  %p170_p4 = scmp.lt.s32.totalorder %s18_s13, %s18_s13 }
   0xb   :  { %p166_p3 = scmp.ne.s32.totalorder %s18_s13, %s165_s23  ;;  %p171_p5 = scmp.lt.s32.totalorder %s165_s23, %s165_s23 }
   0xd   :  { %p172_p6 = por %p171_p5, %p170_p4 }
   0xf   :  { %p173_p7 = pnand %p172_p6, %p166_p3 }
  0x11   :  { %176 = shalt.err (!%p173_p7)
}
  0x12   :  { %20 = dma.hbm_to_vmem [thread:$0]  %s291_s0, 32, %s18_s13, [#allocation3]  }
  0x13   :  { %s177_s28 = scalar_lea.hbm %s292_s1, 128 }
  0x14   :  { %p178_p8 = scmp.ne.s32.totalorder %s292_s1, %s177_s28  ;;  %p181_p9 = scmp.lt.u32.totalorder %s177_s28, %s292_s1 }
  0x16   :  { %p183_p10 = pnand %p181_p9, %p178_p8 }
  0x18   :  { %186 = shalt.err (!%p183_p10)
}
  0x19   :  { %s187_s6 = scalar_lea.vmem %s28_s15, 128  ;;  %p192_p12 = scmp.lt.s32.totalorder %s28_s15, %s28_s15 }
  0x1a   :  { %p188_p11 = scmp.ne.s32.totalorder %s28_s15, %s187_s6  ;;  %p193_p13 = scmp.lt.s32.totalorder %s187_s6, %s187_s6 }
  0x1c   :  { %p194_p0 = por %p193_p13, %p192_p12 }
  0x1e   :  { %p195_p1 = pnand %p194_p0, %p188_p11 }
  0x20   :  { %198 = shalt.err (!%p195_p1)
}
  0x21   :  { %30 = dma.hbm_to_vmem [thread:$0]  %s292_s1, 128, %s28_s15, [#allocation6]  }
  0x22   :  { %221 = dma.done.wait [#allocation3], 32  }
  0x23   :  { %222 = vsyncadd [#allocation3], 4294967264 }
  0x24   :  { %223 = dma.done.wait [#allocation6], 128  }
  0x25   :  { %224 = vsyncadd [#allocation6], 4294967168  ;;  %v229_v0 = vmov 0.0   ;;  %vm230_vm0 = vmmov 0   ;;  %vm48_vm1 = vcmask 64512   ;;  %v40_v1 = vld [vmem:[#allocation5] sm:$0xff] }
  0x26   :  { %145 = vmatprep.subr.mxu0 %v229_v0  ;;  %147 = vmatprep.mubr.msk.f32.mxu0 %vm230_vm0, %v229_v0  ;;  %v39_v2 = vld [vmem:[#allocation2] sm:$0x3]  ;;  %s231_s10 = smov [#allocation7]   ;;  %vm123_vm2 = vcmask 58368  }
  0x27   :  { %146 = vmatpush3.msra.mxu0 %v40_v1  ;;  %v141_v3 = vld [vmem:[%s293_s2] ss:$0 sm:$0xff]  ;;  %s131_s1 = sshll.u32 %s231_s10, 4  ;;  %s132_s1 = int_to_ptr.vmem [resolvable:$true] %s131_s1 }
  0x28   :  { %148 = vmatmul.mubr.msk.f32.vlgmr.msra.gmra.mrb[0].mxu0 %vm48_vm1, %v39_v2  ;;  %s199_s11 = scalar_lea.vmem %s132_s1, 32  ;;  %p204_p3 = scmp.lt.s32.totalorder %s132_s1, %s132_s1 }
  0x29   :  { %p200_p2 = scmp.ne.s32.totalorder %s132_s1, %s199_s11  ;;  %p205_p4 = scmp.lt.s32.totalorder %s199_s11, %s199_s11 }
  0x2b   :  { %p206_p5 = por %p205_p4, %p204_p3 }
  0x2d   :  { %p207_p6 = pnand %p206_p5, %p200_p2 }
  0xfb   :  { %v118_v4 = vpop.f32.mrb[0].mxu0 }
  0xfc   :  { %v119_v5 = vadd.f32 %v141_v3, %v118_v4  ;;  %v149_v6 = vpop.f32.mrb[1].mxu0 }
  0xfe   :  { %v122_v7 = vmax.f32 %v119_v5, 0.0 }
 0x100   :  { %124 = vst.msk [vmem:[#allocation7] sm:$0x3] %vm123_vm2, %v122_v7 }
 0x101   :  { %210 = shalt.err (!%p207_p6)
}
 0x102   :  { %s211_s2 = scalar_lea.hbm %s294_s3, 32 }
 0x103   :  { %p212_p7 = scmp.ne.s32.totalorder %s294_s3, %s211_s2  ;;  %p215_p8 = scmp.lt.u32.totalorder %s211_s2, %s294_s3 }
 0x105   :  { %p217_p9 = pnand %p215_p8, %p212_p7 }
 0x107   :  { %220 = shalt.err (!%p217_p9)
}
 0x108   :  { %134 = dma.vmem_to_hbm [thread:$0]  %s132_s1, 32, %s294_s3, [#allocation4]  }
 0x109   :  { %225 = dma.done.wait [#allocation4], 32  }
 0x10a   :  { %226 = vsyncadd [#allocation4], 4294967264 }
 0x10b   :  { %138 = vsyncpa [#allocation3], 1 }
 0x10c   :  { %139 = vsyncpa [#allocation6], 1 }
 0x10d   :  { %140 = vsyncpa [#allocation4], 1 }

</bundles_post_ra>
